<compile_context>
chip_gen: v5e
topology: v5e:2x2
jax: 0.10.0
libtpu: 0.0.40
codegen_flags: <defaults>
</compile_context>

<pallas_src>
import functools
import math

import jax
import jax.numpy as jnp
import numpy as np
from jax import lax
from jax.experimental import pallas as pl
from jax.experimental.pallas import tpu as pltpu


# ----------------------------------------------------------------------------
# Pallas kernel: fused (conv + folded-BN bias + optional ReLU) for one image
# ----------------------------------------------------------------------------
def _conv_row_band_kernel(x_ref, w_ref, bias_ref, o_ref, *, kh, stride, relu):
    # x_ref:    (1, H, W*C)       bf16  one full NHWC image, (W, C) flattened to lanes
    # w_ref:    (KH, W*C, OW*OC)  bf16  banded, BN-scale-folded conv weights
    # bias_ref: (1, OW*OC)        f32   folded BN bias tiled across OW
    # o_ref:    (1, OH, OW*OC)    bf16
    oh = o_ref.shape[1]
    acc = jnp.zeros(o_ref.shape[1:], jnp.float32)
    for i in range(kh):  # static unroll over kernel rows (KH matmuls)
        if stride == 1:
            a = x_ref[0, pl.ds(i, oh), :]              # (OH, W*C)
        else:
            # TODO(synk): strided row gather; for production prefer halo DMA.
            a = x_ref[0, pl.ds(i, oh, stride), :]
        acc = acc + jnp.dot(a, w_ref[i], preferred_element_type=jnp.float32)
    y = acc + bias_ref[...]
    if relu:  # static trace-time branch (relu=False honored)
        y = jnp.maximum(y, 0.0)
    o_ref[0] = y.astype(o_ref.dtype)


def _fused_conv_call(x2d, w_band, bias_row, *, kh, oh, stride, relu,
                     out_dtype=jnp.bfloat16):
    n, h, wc = x2d.shape
    _, _, owoc = w_band.shape

    cost = pl.CostEstimate(
        flops=2 * n * kh * oh * wc * owoc,
        transcendentals=0,
        bytes_accessed=(x2d.size * x2d.dtype.itemsize
                        + w_band.size * w_band.dtype.itemsize
                        + bias_row.size * bias_row.dtype.itemsize
                        + n * oh * owoc * jnp.dtype(out_dtype).itemsize))

    return pl.pallas_call(
        functools.partial(_conv_row_band_kernel, kh=kh, stride=stride, relu=relu),
        out_shape=jax.ShapeDtypeStruct((n, oh, owoc), out_dtype),
        grid_spec=pltpu.PrefetchScalarGridSpec(
            num_scalar_prefetch=0,
            grid=(n,),  # one image per step; balanced across v7x cores
            in_specs=[
                pl.BlockSpec((1, h, wc), lambda i: (i, 0, 0)),
                pl.BlockSpec((kh, wc, owoc), lambda i: (0, 0, 0)),  # grid-invariant
                pl.BlockSpec((1, owoc), lambda i: (0, 0)),          # grid-invariant
            ],
            out_specs=pl.BlockSpec((1, oh, owoc), lambda i: (i, 0, 0)),
        ),
        compiler_params=pltpu.CompilerParams(
            dimension_semantics=("parallel",),
            vmem_limit_bytes=32 * 1024 * 1024),  # headroom for bigger tiles on v5e
        cost_estimate=cost,
    )(x2d, w_band, bias_row)


# ----------------------------------------------------------------------------
# Wrapper: NCHW conv + BN(eval) + ReLU.  The NCHW<->NHWC transposes are kept
# only to preserve the PyTorch module's layout contract; an NHWC model would
# drop both glue passes.
# ----------------------------------------------------------------------------
def conv2d_bn_relu(x_nchw, weight_oihw, gamma, beta, run_mean, run_var,
                   *, stride=1, eps=1e-5, relu=True, bn=True, conv_bias=None,
                   compute_dtype=jnp.bfloat16):
    N, C, H, W = x_nchw.shape
    OC, _, KH, KW = weight_oihw.shape
    OH = (H - KH) // stride + 1
    OW = (W - KW) // stride + 1

    # Fold BN (inference mode) scale into the weights, keep only a bias.
    if bn:
        inv_std = gamma / jnp.sqrt(run_var + eps)
        w_fold = weight_oihw * inv_std[:, None, None, None]
        bias = beta - run_mean * inv_std
    else:
        w_fold = weight_oihw
        bias = (conv_bias if conv_bias is not None
                else jnp.zeros((OC,), jnp.float32))

    # x: NCHW -> NHWC, cast to bf16 FIRST (halves every downstream byte),
    # then flatten (W, C) into the lane dim: (N, H, W*C).
    x_nhwc = jnp.transpose(x_nchw, (0, 2, 3, 1)).astype(compute_dtype)
    x2d = x_nhwc.reshape(N, H, W * C)

    # Banded weight:  B[i, w'*C + c, ow*OC + oc] = w_fold[oc, c, i, w' - ow*stride]
    # (zero where w' - ow*stride is outside [0, KW)).  One-time, tiny build.
    w_k = jnp.transpose(w_fold, (2, 3, 1, 0))                     # (KH, KW, C, OC)
    j = jnp.arange(W)[:, None] - jnp.arange(OW)[None, :] * stride  # (W, OW)
    valid = (j >= 0) & (j < KW)
    jc = jnp.clip(j, 0, KW - 1)
    Bi = w_k[:, jc]                                                # (KH, W, OW, C, OC)
    Bi = jnp.where(valid[None, :, :, None, None], Bi, 0.0)
    w_band = jnp.transpose(Bi, (0, 1, 3, 2, 4)).reshape(KH, W * C, OW * OC)
    w_band = w_band.astype(compute_dtype)

    bias_row = jnp.tile(bias.astype(jnp.float32), OW).reshape(1, OW * OC)

    y = _fused_conv_call(x2d, w_band, bias_row,
                         kh=KH, oh=OH, stride=stride, relu=relu)  # (N, OH, OW*OC) bf16

    # (N, OH, OW*OC) -> (N, OH, OW, OC) -> NCHW (module layout), f32 output dtype.
    y = y.reshape(N, OH, OW, OC).astype(jnp.float32)
    return jnp.transpose(y, (0, 3, 1, 2))


# ----------------------------------------------------------------------------
# Main: deterministic params/inputs, run once, verify, print KERNEL_OK.
# ----------------------------------------------------------------------------
if __name__ == "__main__":
    key = jax.random.PRNGKey(0)
    k_x, k_w = jax.random.split(key)

    # Module config: Conv2d(in_channels=4, out_channels=8, kernel_size=3,
    #                       stride=1, relu=True, bn=True) -> conv has no bias.
    N, C, H, W = 2, 4, 16, 16
    OC, KH, KW, STRIDE = 8, 3, 3, 1
    EPS = 1e-5

    x = jax.random.normal(k_x, (N, C, H, W), dtype=jnp.float32)

    # Xavier-uniform conv weight (deterministic), matching init_uniform('xavier').
    fan_in = C * KH * KW
    fan_out = OC * KH * KW
    bound = math.sqrt(6.0 / (fan_in + fan_out))
    weight = jax.random.uniform(k_w, (OC, C, KH, KW), dtype=jnp.float32,
                                minval=-bound, maxval=bound)

    # BatchNorm2d default-init parameters (eval mode).
    gamma = jnp.ones((OC,), jnp.float32)
    beta = jnp.zeros((OC,), jnp.float32)
    run_mean = jnp.zeros((OC,), jnp.float32)
    run_var = jnp.ones((OC,), jnp.float32)

    out = conv2d_bn_relu(x, weight, gamma, beta, run_mean, run_var,
                         stride=STRIDE, eps=EPS, relu=True)
    out = jax.block_until_ready(out)

    # Reference: same bf16-rounded operands, f32 accumulation (XLA conv).
    inv_std = gamma / jnp.sqrt(run_var + EPS)
    w_fold = weight * inv_std.reshape(OC, 1, 1, 1)
    b_fold = beta - run_mean * inv_std
    x_bf = x.astype(jnp.bfloat16).astype(jnp.float32)
    w_bf = w_fold.astype(jnp.bfloat16).astype(jnp.float32)
    lin = lax.conv_general_dilated(
        x_bf, w_bf, window_strides=(STRIDE, STRIDE), padding="VALID",
        dimension_numbers=("NCHW", "OIHW", "NCHW"),
        precision=lax.Precision.HIGHEST)
    lin = lin + b_fold.reshape(1, OC, 1, 1)
    ref_relu = jnp.maximum(lin, 0.0)

    OH, OW = H - KH + 1, W - KW + 1
    assert out.shape == (N, OC, OH, OW)
    # Kernel output is bf16 -> allow ~one bf16 ulp of relative error.
    np.testing.assert_allclose(np.asarray(out), np.asarray(ref_relu),
                               rtol=2e-2, atol=2e-2)

    # relu=False path (static flag) must also be honored.
    out_lin = conv2d_bn_relu(x, weight, gamma, beta, run_mean, run_var,
                             stride=STRIDE, eps=EPS, relu=False)
    out_lin = jax.block_until_ready(out_lin)
    np.testing.assert_allclose(np.asarray(out_lin), np.asarray(lin),
                               rtol=2e-2, atol=2e-2)

    print("KERNEL_OK")
</pallas_src>

<mosaic_0001>
module attributes {stable_mosaic.version = 11 : i64} {
  func.func @_conv_row_band_kernel(%arg0: i32, %arg1: memref<1x16x64xbf16, #tpu.memory_space<vmem>>, %arg2: memref<3x64x112xbf16, #tpu.memory_space<vmem>>, %arg3: memref<1x112xf32, #tpu.memory_space<vmem>>, %arg4: memref<1x14x112xbf16, #tpu.memory_space<vmem>>) attributes {dimension_semantics = [#tpu.dimension_semantics<parallel>], iteration_bounds = array<i64: 2>, scalar_prefetch = 0 : i64, scratch_operands = 0 : i64, tpu.core_type = #tpu.core_type<tc>, window_params = [{transform_indices = @transform_0, window_bounds = array<i64: 1, 16, 64>}, {pipeline_mode = #tpu.pipeline_mode<synchronous>, transform_indices = @transform_1, window_bounds = array<i64: 3, 64, 112>}, {pipeline_mode = #tpu.pipeline_mode<synchronous>, transform_indices = @transform_2, window_bounds = array<i64: 1, 112>}, {transform_indices = @transform_3, window_bounds = array<i64: 1, 14, 112>}]} {
    %cst = arith.constant 0.000000e+00 : f32
    %0 = vector.broadcast %cst : f32 to vector<14x112xf32>
    %c0 = arith.constant 0 : index
    %c0_0 = arith.constant 0 : index
    %c0_1 = arith.constant 0 : index
    %1 = vector.load %arg1[%c0, %c0_0, %c0_1] : memref<1x16x64xbf16, #tpu.memory_space<vmem>>, vector<1x14x64xbf16>
    %2 = vector.shape_cast %1 : vector<1x14x64xbf16> to vector<14x64xbf16>
    %c0_2 = arith.constant 0 : index
    %c0_3 = arith.constant 0 : index
    %c0_4 = arith.constant 0 : index
    %3 = vector.load %arg2[%c0_2, %c0_3, %c0_4] : memref<3x64x112xbf16, #tpu.memory_space<vmem>>, vector<1x64x112xbf16>
    %4 = vector.shape_cast %3 : vector<1x64x112xbf16> to vector<64x112xbf16>
    %cst_5 = arith.constant dense<0.000000e+00> : vector<14x112xf32>
    %5 = tpu.matmul %2, %4, %cst_5 {dimension_numbers = #tpu.dot_dimension_numbers<[1], [0], [0], [1], [0, 0, 1, 1], [], []>} : vector<14x64xbf16>, vector<64x112xbf16>, vector<14x112xf32> -> vector<14x112xf32>
    %6 = arith.addf %0, %5 : vector<14x112xf32>
    %c0_6 = arith.constant 0 : index
    %c1 = arith.constant 1 : index
    %c0_7 = arith.constant 0 : index
    %7 = vector.load %arg1[%c0_6, %c1, %c0_7] : memref<1x16x64xbf16, #tpu.memory_space<vmem>>, vector<1x14x64xbf16>
    %8 = vector.shape_cast %7 : vector<1x14x64xbf16> to vector<14x64xbf16>
    %c1_8 = arith.constant 1 : index
    %c0_9 = arith.constant 0 : index
    %c0_10 = arith.constant 0 : index
    %9 = vector.load %arg2[%c1_8, %c0_9, %c0_10] : memref<3x64x112xbf16, #tpu.memory_space<vmem>>, vector<1x64x112xbf16>
    %10 = vector.shape_cast %9 : vector<1x64x112xbf16> to vector<64x112xbf16>
    %cst_11 = arith.constant dense<0.000000e+00> : vector<14x112xf32>
    %11 = tpu.matmul %8, %10, %cst_11 {dimension_numbers = #tpu.dot_dimension_numbers<[1], [0], [0], [1], [0, 0, 1, 1], [], []>} : vector<14x64xbf16>, vector<64x112xbf16>, vector<14x112xf32> -> vector<14x112xf32>
    %12 = arith.addf %6, %11 : vector<14x112xf32>
    %c0_12 = arith.constant 0 : index
    %c2 = arith.constant 2 : index
    %c0_13 = arith.constant 0 : index
    %13 = vector.load %arg1[%c0_12, %c2, %c0_13] : memref<1x16x64xbf16, #tpu.memory_space<vmem>>, vector<1x14x64xbf16>
    %14 = vector.shape_cast %13 : vector<1x14x64xbf16> to vector<14x64xbf16>
    %c2_14 = arith.constant 2 : index
    %c0_15 = arith.constant 0 : index
    %c0_16 = arith.constant 0 : index
    %15 = vector.load %arg2[%c2_14, %c0_15, %c0_16] : memref<3x64x112xbf16, #tpu.memory_space<vmem>>, vector<1x64x112xbf16>
    %16 = vector.shape_cast %15 : vector<1x64x112xbf16> to vector<64x112xbf16>
    %cst_17 = arith.constant dense<0.000000e+00> : vector<14x112xf32>
    %17 = tpu.matmul %14, %16, %cst_17 {dimension_numbers = #tpu.dot_dimension_numbers<[1], [0], [0], [1], [0, 0, 1, 1], [], []>} : vector<14x64xbf16>, vector<64x112xbf16>, vector<14x112xf32> -> vector<14x112xf32>
    %18 = arith.addf %12, %17 : vector<14x112xf32>
    %c0_18 = arith.constant 0 : index
    %c0_19 = arith.constant 0 : index
    %19 = vector.load %arg3[%c0_18, %c0_19] : memref<1x112xf32, #tpu.memory_space<vmem>>, vector<1x112xf32>
    %20 = vector.broadcast %19 : vector<1x112xf32> to vector<14x112xf32>
    %21 = arith.addf %18, %20 : vector<14x112xf32>
    %cst_20 = arith.constant 0.000000e+00 : f32
    %22 = vector.broadcast %cst_20 : f32 to vector<14x112xf32>
    %23 = arith.maximumf %21, %22 : vector<14x112xf32>
    %24 = arith.truncf %23 : vector<14x112xf32> to vector<14x112xbf16>
    %c0_21 = arith.constant 0 : index
    %c0_22 = arith.constant 0 : index
    %c0_23 = arith.constant 0 : index
    %25 = vector.load %arg4[%c0_21, %c0_22, %c0_23] : memref<1x14x112xbf16, #tpu.memory_space<vmem>>, vector<1x14x112xbf16>
    %26 = vector.shape_cast %25 : vector<1x14x112xbf16> to vector<14x112xbf16>
    %27 = vector.shape_cast %24 : vector<14x112xbf16> to vector<1x14x112xbf16>
    tpu.vector_store %arg4[%c0_21, %c0_22, %c0_23], %27 {strides = array<i32>} : memref<1x14x112xbf16, #tpu.memory_space<vmem>>, vector<1x14x112xbf16>,
    return
  }
  func.func @transform_0(%arg0: i32) -> (i32, i32, i32) {
    %c0_i32 = arith.constant 0 : i32
    %c0_i32_0 = arith.constant 0 : i32
    %c0_i32_1 = arith.constant 0 : i32
    return %arg0, %c0_i32, %c0_i32_0 : i32, i32, i32
  }
  func.func @transform_1(%arg0: i32) -> (i32, i32, i32) {
    %c0_i32 = arith.constant 0 : i32
    %c0_i32_0 = arith.constant 0 : i32
    %c0_i32_1 = arith.constant 0 : i32
    %c0_i32_2 = arith.constant 0 : i32
    return %c0_i32, %c0_i32_0, %c0_i32_1 : i32, i32, i32
  }
  func.func @transform_2(%arg0: i32) -> (i32, i32) {
    %c0_i32 = arith.constant 0 : i32
    %c0_i32_0 = arith.constant 0 : i32
    %c0_i32_1 = arith.constant 0 : i32
    return %c0_i32, %c0_i32_0 : i32, i32
  }
  func.func @transform_3(%arg0: i32) -> (i32, i32, i32) {
    %c0_i32 = arith.constant 0 : i32
    %c0_i32_0 = arith.constant 0 : i32
    %c0_i32_1 = arith.constant 0 : i32
    return %arg0, %c0_i32, %c0_i32_0 : i32, i32, i32
  }
}

</mosaic_0001>

<bundles_post_ra>
// kernel: tpu_custom_call.1
= control target key start
LH: loop header
LB: loop body
LE: loop exit
PB: predicated region body
PF: predicated region fallthrough
CT: control target
= control target key end

     0   :  { %8 = vsyncpa [#allocation3], 0  ;;  %s852_s0 = inlined_call_operand.hbm [shape: bf16[2,16,64], index: 0, kind: input, shape index: {}]   ;;  %s853_s1 = inlined_call_operand.hbm [shape: bf16[3,64,112], index: 1, kind: input, shape index: {}]   ;;  %s854_s2 = inlined_call_operand.vmem [shape: f32[1,112], index: 2, kind: input, shape index: {}]   ;;  %s855_s3 = inlined_call_operand.vmem [shape: bf16[2,14,112], index: 3, kind: output, shape index: {}]  }
   0x1   :  { %10 = vsyncpa [#allocation3 + $0x1], 0 }
   0x2   :  { %11 = vsyncpa [#allocation5], 0  ;;  %s740_s12 = smov 0   ;;  %s742_s13 = smov 0  }
   0x3   :  { %s744_s14 = smov 0   ;;  %s746_s15 = smov 0  }
   0x4 LB: > { %s759_s16 = sadd.s32 4294967295, %s715_s15   ;;  %p37_p0 = scmp.ne.s32.totalorder %s707_s13, %s703_s12  ;;  %s715_s15 = sphi %s746_s15, %s862_s15   ;;  %s711_s14 = sphi %s744_s14, %s861_s14   ;;  %s707_s13 = sphi %s742_s13, %s860_s13   ;;  %s703_s12 = sphi %s740_s12, %s859_s12  }
   0x5   : > { %p38_p1 = scmp.eq.s32.totalorder %s759_s16, 0  ;;  %p478_p2 = scmp.ge.s32.totalorder %s715_s15, 1 }
   0x6   : > { %p116_p3 = scmp.lt.s32.totalorder %s715_s15, 3  ;;  %s127_s20 = sshll.u32 %s853_s1, 4  ;;  %s128_s20 = int_to_ptr.hbm [resolvable:$true] %s127_s20 }
   0x7   : > { %p767_p4 = por %p38_p1, %p37_p0  ;;  %s717_s22 = smov [#allocation4]  }
   0x8   : > { %p774_p5 = pnand %p478_p2, %p116_p3  ;;  %s129_s23 = sshll.u32 %s717_s22, 4  ;;  %s130_s23 = int_to_ptr.vmem [resolvable:$true] %s129_s23 }
   0x9   : > { %s783_s24 = sadd.s32 1, %s715_s15   ;;  %s718_s25 = smov 64  }
   0xa   : > { %p562_p6 = pneg %p774_p5  ;;  %s719_s26 = smov 4  }
   0xb   : > { %s21_s27 = ssub.s32 %s715_s15, %s783_s24  ;;  %s24_s28 = sadd.s32 1, %s711_s14 }
   0xc   : > { %p563_p7 = pnand %p562_p6, %p38_p1  ;;  %p22_p8 = scmp.eq.s32.totalorder %s21_s27, 0 }
   0xd   : > { %p31_p9 = scmp.ne.s32.totalorder %s711_s14, %s707_s13  ;;  %p32_p10 = scmp.eq.s32.totalorder %s715_s15, 0 }
   0xe   : > { %565 = dma.hbm_to_vmem [thread:$0]  (!%p563_p7), %s128_s20, 1536, %s130_s23, [#allocation5], %s718_s25, %s718_s25, %s719_s26  }
   0xf   : > { %p571_p11 = scmp.lt.s32.totalorder %s715_s15, 2  ;;  %p33_p12 = por %p32_p10, %p31_p9 }
  0x10   : > { %s796_s29 = scalar_select %p22_p8, %s711_s14, %s24_s28  }
  0x11   : > { %s146_s30 = sand.u32 1, %s711_s14   ;;  %s542_s5 = sshll.u32 %s715_s15, 3 }
  0x12   : > { %s481_s4 = sshll.u32 %s146_s30, 3  ;;  %s155_s8 = scalar_lea.hbm %s852_s0, %s542_s5 }
  0x13   : > { %s150_s9 = scalar_lea.vmem [#allocation2], %s481_s4  ;;  %s156_s11 = sshll.u32 %s155_s8, 4  ;;  %s157_s11 = int_to_ptr.hbm [resolvable:$true] %s156_s11 }
  0x14   : > { %s158_s10 = sshll.u32 %s150_s9, 4  ;;  %p803_p13 = pnand %p571_p11, %p33_p12  ;;  %s159_s10 = int_to_ptr.vmem [resolvable:$true] %s158_s10 }
  0x15   : > { %s147_s18 = scalar_lea.sflag [#allocation3], %s146_s30  ;;  %s646_s19 = sshra.s32 %s157_s11, 4  ;;  %s647_s19 = int_to_ptr.hbm [resolvable:$true] %s646_s19 }
  0x16   : > { %s648_s20 = scalar_lea.hbm %s647_s19, 8  ;;  %p650_p2 = pneg %p803_p13 }
  0x17   : > { %p649_p0 = scmp.ne.s32.totalorder %s647_s19, %s648_s20  ;;  %s653_s23 = scalar_lea.hbm %s852_s0, 16 }
  0x18   : > { %p654_p7 = scmp.lt.s32.totalorder %s647_s19, %s852_s0  ;;  %p655_p8 = scmp.lt.s32.totalorder %s653_s23, %s648_s20 }
  0x19   : > { %p651_p3 = pnand %p650_p2, %p649_p0 }
  0x1a   : > { %p656_p9 = por %p655_p8, %p654_p7 }
  0x1b   : > { %p652_p6 = pneg %p651_p3 }
  0x1d   : > { %p657_p10 = pnand %p656_p9, %p652_p6 }
  0x1f   : > { %660 = shalt.err (!%p657_p10)
}
  0x20   : > { %569 = dma.hbm_to_vmem [thread:$0]  (!%p803_p13), %s157_s11, 128, %s159_s10, %s147_s18, %s718_s25, %s718_s25, %s719_s26  }
  0x21   : > { %170 = sbr.rel (%p774_p5) target bundleno = 208 (0xd0), region = 32  ;;  %s172_s30 = sand.u32 (!%p774_p5), 1, %s707_s13  }
  0x22   : > { %s485_s4 = sshll.u32 (!%p774_p5), %s172_s30, 3  ;;  %s173_s5 = scalar_lea.sflag (!%p774_p5), [#allocation3], %s172_s30 }
  0x23   : > { %s176_s6 = scalar_lea.vmem (!%p774_p5), [#allocation2], %s485_s4 }
  0x26   : > { %693 = dma.done.wait (%p767_p4), %s173_s5, 128  }
  0x27   : > { %695 = vsyncadd (%p767_p4), %s173_s5, 4294967168 }
  0x28   : > { %697 = dma.done.wait (%p38_p1), [#allocation5], 1536  }
  0x29   : > { %699 = vsyncadd (%p38_p1), [#allocation5], 4294965760  ;;  %v551_v0 = vld [vmem:[#allocation4 + $0x38] sm:$0xff]  ;;  %v550_v3 = vld [vmem:[#allocation4 + $0x30] sm:$0xff]  ;;  %vm267_vm0 = vcmask 523264   ;;  %p205_p1 = scmp.lt.s32.totalorder %s759_s16, 1 }
  0x2a   : > { %v547_v1 = vld [vmem:[#allocation4 + $0x18] sm:$0xff]  ;;  %275 = vmatpush.bf16.msra.mxu0 %v551_v0  ;;  %v546_v4 = vld [vmem:[#allocation4 + $0x10] sm:$0xff]  ;;  %v549_v10 = vld [vmem:[#allocation4 + $0x28] sm:$0xff]  ;;  %vm396_vm1 = vcmask 912384   ;;  %vm398_vm2 = vcmask 911360  }
  0x2b   : > { %v555_v2 = vld [vmem:[#allocation4 + $0x58] sm:$0xff]  ;;  %319 = vmatpush.bf16.msra.mxu1 %v547_v1  ;;  %v554_v5 = vld [vmem:[#allocation4 + $0x50] sm:$0xff]  ;;  %v545_v11 = vld [vmem:[#allocation4 + $0x8] sm:$0xff]  ;;  %s864_s16 = smov (!%p205_p1, %s759_s16), 1 }
  0x2c   : > { %374 = vmatpush.bf16.msra.mxu2 %v555_v2  ;;  %v211_v6 = vld [vmem:[%s176_s6] sm:$0xff]   ;;  %v553_v13 = vld [vmem:[#allocation4 + $0x48] sm:$0xff]  ;;  %v548_v16 = vld [vmem:[#allocation4 + $0x20] sm:$0xff]  ;;  %s543_s25 = sshll.u32 %s864_s16, 3 }
  0x2d   : > { %v614_v7 = vld [vmem:[%s176_s6] sm:$0xf]   ;;  %v609_v8 = vld [vmem:[%s176_s6] sm:$0xf0]  ;;  %v237_v14 = vshrl.u32 %v211_v6, 16  ;;  %v239_v15 = vshll.u32 %v211_v6, 16  ;;  %s209_s8 = scalar_lea.vmem %s855_s3, %s543_s25 }
  0x2e   : > { %v610_v9 = vld [vmem:[%s176_s6] sm:$0xe]  ;;  %276 = vmatpush.bf16.msra.mxu0 %v550_v3  ;;  %v700_v12 = vld [vmem:[%s176_s6] sm:$0x70]  ;;  %v544_v17 = vld [vmem:[#allocation4] sm:$0xff] }
  0x2f   : > { %320 = vmatpush.bf16.msra.mxu1 %v546_v4  ;;  %v611_v18 = vor.u32 %v610_v9, %v609_v8  ;;  %v552_v19 = vld [vmem:[#allocation4 + $0x40] sm:$0xff]  ;;  %v241_v20 = vrot.slane %v239_v15, 1  ;;  %v615_v22 = vor.u32 %v700_v12, %v614_v7  ;;  %v608_v27 = vld [vmem:[%s854_s2] ss:$0 sm:$0xff] }
  0x30   : > { %375 = vmatpush.bf16.msra.mxu2 %v554_v5 }
  0x31   : > { %v242_v21 = vor.u32 %v241_v20, %v237_v14  ;;  %v342_v23 = vrot.slane %v611_v18, 1 }
  0x32   : > { %277 = vmatpush.bf16.msra.mxu0 %v549_v10 }
  0x33   : > { %321 = vmatpush.bf16.msra.mxu1 %v545_v11 }
  0x34   : > { %376 = vmatpush.bf16.msra.mxu2 %v553_v13 }
  0x36   : > { %278 = vmatpush.bf16.msra.mxu0 %v548_v16 }
  0x37   : > { %322 = vmatpush.bf16.msra.mxu1 %v544_v17 }
  0x38   : > { %377 = vmatpush.bf16.msra.mxu2 %v552_v19 }
  0x39   : > { %505 = vmatmul.msk.bf16.vlgmr.msra.gmra.mxu0 %vm267_vm0, %v242_v21 }
  0x3a   : > { %522 = vmatmul.msk.bf16.vlgmr.msra.gmra.mxu1 %vm267_vm0, %v615_v22 }
  0x3b   : > { %539 = vmatmul.msk.bf16.vlgmr.msra.gmra.mxu2 %vm267_vm0, %v342_v23 }
  0xb6   : > { %v280_v24 = vpop.f32.mrf.mxu0 }
  0xb7   : > { %v324_v25 = vpop.f32.mrf.mxu1 }
  0xb8   : > { %v325_v26 = vadd.f32 %v324_v25, %v280_v24 }
  0xbe   : > { %v379_v28 = vpop.f32.mrf.mxu2  ;;  %v282_v31 = vpop.f32.mrf.mxu0 }
  0xbf   : > { %v384_v29 = vadd.f32 %v379_v28, %v325_v26  ;;  %v326_v32 = vpop.f32.mrf.mxu1 }
  0xc0   : > { %v327_v35 = vadd.f32 %v326_v32, %v282_v31 }
  0xc1   : > { %v390_v30 = vadd.f32 %v608_v27, %v384_v29 }
  0xc3   : > { %v392_v33 = vmax.f32 %v390_v30, 0.0 }
  0xc5   : > { %v394_v34 = vpack.c.bf16 %v392_v33, %v392_v33 }
  0xc6   : > { %v381_v36 = vpop.f32.mrf.mxu2 }
  0xc7   : > { %397 = vst.msk [vmem:[%s209_s8] sm:$0xf] %vm396_vm1, %v394_v34  ;;  %v385_v37 = vadd.f32 %v381_v36, %v327_v35 }
  0xc9   : > { %v391_v38 = vadd.f32 %v608_v27, %v385_v37 }
  0xcb   : > { %v393_v39 = vmax.f32 %v391_v38, 0.0 }
  0xcd   : > { %v395_v40 = vpack.c.bf16 %v393_v39, %v393_v39 }
  0xcf   : > { %399 = vst.msk [vmem:[%s209_s8 + $0x4] sm:$0x7] %vm398_vm2, %v395_v40 }
  0xd0 PF: > { %p14_p4 = scmp.ge.s32.totalorder %s783_s24, 4   ;;  %s859_s12 = smov %s707_s13 }
  0xd1   : > { %s860_s13 = smov %s711_s14  ;;  %s861_s14 = smov %s796_s29 }
  0xd2   : > { %s862_s15 = smov %s783_s24  ;;  %16 = sbr.rel (!%p14_p4) target bundleno = 4 (0x4), region = 78 }
  0xd7   :  { %421 = vsyncpa [#allocation3], 1 }
  0xd8   :  { %423 = vsyncpa [#allocation3 + $0x1], 1 }
  0xd9   :  { %424 = vsyncpa [#allocation5], 1 }

</bundles_post_ra>
